<compile_context>
chip_gen: v5e
topology: v5e:2x2
jax: 0.10.0
libtpu: 0.0.40
codegen_flags: <defaults>
</compile_context>

<pallas_src>
import functools

import jax
import jax.numpy as jnp
from jax import lax
from jax.experimental import pallas as pl
from jax.experimental.pallas import tpu as pltpu


def _round_up(x, m):
    return ((x + m - 1) // m) * m


# ----------------------------------------------------------------------------
# One-time probe of pltpu.roll rotation direction (does element i move to
# i+shift, i.e. jnp.roll semantics?).  Result is baked into the kernel as a
# static shift so the gate-alignment rolls are correct either way.
# ----------------------------------------------------------------------------
@functools.lru_cache(maxsize=None)
def _roll_is_forward():
    def probe(x_ref, o_ref):
        o_ref[...] = pltpu.roll(x_ref[...], 1, axis=1)

    x = jnp.broadcast_to(jnp.arange(256, dtype=jnp.float32), (8, 256))
    out = pl.pallas_call(
        probe,
        out_shape=jax.ShapeDtypeStruct((8, 256), jnp.float32),
        in_specs=[pl.BlockSpec(memory_space=pltpu.MemorySpace.VMEM)],
        out_specs=pl.BlockSpec(memory_space=pltpu.MemorySpace.VMEM),
    )(x)
    return bool(jax.device_get(out)[0, 1] == 0.0)


# ----------------------------------------------------------------------------
# Fused encoder kernel: all GRU layers + both directions in one pallas_call.
# Per-direction block of width Gp (=128 for H=32): gate columns r|z|n at lane
# offsets 0, H, 2H; the hidden state lives on the n-gate lanes [2H:3H].
# Full packed width W2 = 2*Gp: fwd block at [0:Gp], bwd block at [Gp:2Gp].
# ----------------------------------------------------------------------------
def make_encoder_kernel(n_layers, S, Bp, H, Gp, num_bufs, roll_fwd):
    W2 = 2 * Gp

    def eff(shift):  # static, corrected for pltpu.roll rotation direction
        return shift if roll_fwd else (W2 - shift) % W2

    s_r2n = eff(2 * H)               # move r lanes onto the n/h lanes
    s_z2n = eff(H)                   # move z lanes onto the n/h lanes

    def kernel(*refs):
        x_ref = refs[0]                                   # (S*Bp, Ep)
        w_refs = refs[1:1 + 4 * n_layers]
        y_out_ref = refs[1 + 4 * n_layers]                # (S*Bp, W2) f32
        h_out_ref = refs[2 + 4 * n_layers]                # (2*n_layers, Bp, Gp)
        s0 = 3 + 4 * n_layers
        gi_ref = refs[s0]                                 # (S*Bp, W2) f32
        h_ref = refs[s0 + 1]                              # (Bp, W2)  f32
        bufs = refs[s0 + 2:s0 + 2 + num_bufs]             # (S*Bp, W2) f32 each

        for l in range(n_layers):
            wih, whh, bih, bhn = w_refs[4 * l:4 * (l + 1)]

            # Layer input slab (time-major, flat).  Cast to the projection
            # dtype (bf16 by default) only at the matmul input.
            if l == 0:
                x_all = x_ref[...]
            else:
                x_all = bufs[(l - 1) % num_bufs][...].astype(wih.dtype)

            # ---- ONE fused fwd+bwd input projection per layer.  b_ih and the
            #      r/z part of b_hh are already folded into `bih` at pack time.
            gi_ref[...] = (
                jnp.dot(x_all, wih[...], preferred_element_type=jnp.float32)
                + bih[...])

            # PyTorch default h0 = 0.
            h_ref[...] = jnp.zeros((Bp, W2), jnp.float32)

            # Only the n-gate half of b_hh stays in the recurrence (it is
            # scaled by r); hoist its broadcast out of the time loop.
            bhn_b = jnp.broadcast_to(bhn[...], (Bp, W2))

            y_dst = y_out_ref if l == n_layers - 1 else bufs[l % num_bufs]

            def step(t, carry):
                # Forward reads time t, backward reads time S-1-t (no reversed
                # copies); both halves are 128-lane-aligned slices.
                row_f = pl.multiple_of(t * Bp, Bp)
                row_b = pl.multiple_of((S - 1 - t) * Bp, Bp)
                gi_t = jnp.concatenate(
                    [gi_ref[pl.ds(row_f, Bp), 0:Gp],
                     gi_ref[pl.ds(row_b, Bp), Gp:W2]], axis=-1)

                h = h_ref[...]
                # Single block-diagonal recurrent matmul for both directions;
                # RHS read straight from VMEM (no hoisted vreg live range).
                gh = jnp.dot(h, whh[...],
                             preferred_element_type=jnp.float32) + bhn_b
                a = gi_t + gh
                sg = jax.nn.sigmoid(a)                 # r @ [0:H], z @ [H:2H]
                r_at_n = pltpu.roll(sg, s_r2n, axis=1)
                z_at_n = pltpu.roll(sg, s_z2n, axis=1)
                n = jnp.tanh(gi_t + r_at_n * gh)       # n @ [2H:3H] (= h lanes)
                h_new = (1.0 - z_at_n) * n + z_at_n * h
                h_ref[...] = h_new

                y_dst[pl.ds(row_f, Bp), 0:Gp] = h_new[:, 0:Gp]
                y_dst[pl.ds(row_b, Bp), Gp:W2] = h_new[:, Gp:W2]
                return carry

            # Unroll short fixed trip counts for LLO scheduling visibility.
            lax.fori_loop(0, S, step, 0, unroll=True if S <= 16 else 8)

            h_out_ref[2 * l] = h_ref[:, 0:Gp]
            h_out_ref[2 * l + 1] = h_ref[:, Gp:W2]

    return kernel


# ----------------------------------------------------------------------------
# Weight packing (all zero-padding, so padded lanes/rows never contaminate the
# real hidden lanes).  Gate columns r|z|n at offsets 0, H, 2H inside each
# direction's Gp-wide block; hidden features on the n-gate lanes [2H:3H].
# ----------------------------------------------------------------------------
def _pack_w_ih(w_ih_f, w_ih_b, layer, H, Gp, Ep, dtype):
    hoff = 2 * H
    if layer == 0:
        in_real = w_ih_f.shape[1]
        out = jnp.zeros((Ep, 2 * Gp), jnp.float32)
        for base, w in ((0, w_ih_f), (Gp, w_ih_b)):
            wt = jnp.asarray(w, jnp.float32).T            # (E, 3H) cols r|z|n
            out = out.at[:in_real, base:base + 3 * H].set(wt)
    else:
        out = jnp.zeros((2 * Gp, 2 * Gp), jnp.float32)
        for base, w in ((0, w_ih_f), (Gp, w_ih_b)):
            wt = jnp.asarray(w, jnp.float32).T            # (2H, 3H)
            out = out.at[hoff:hoff + H, base:base + 3 * H].set(wt[:H])
            out = out.at[Gp + hoff:Gp + hoff + H, base:base + 3 * H].set(wt[H:])
    return out.astype(dtype)


def _pack_w_hh(w_hh_f, w_hh_b, H, Gp):
    hoff = 2 * H
    out = jnp.zeros((2 * Gp, 2 * Gp), jnp.float32)        # block-diagonal
    for base, w in ((0, w_hh_f), (Gp, w_hh_b)):
        wt = jnp.asarray(w, jnp.float32).T                # (H, 3H)
        out = out.at[base + hoff:base + hoff + H, base:base + 3 * H].set(wt)
    return out


def _pack_b_ih(layer_params, H, Gp):
    # b_ih with the r/z part of b_hh folded in (n-gate b_hh cannot fold: it is
    # scaled by r inside the cell).
    out = jnp.zeros((1, 2 * Gp), jnp.float32)
    for base, d in ((0, "fwd"), (Gp, "bwd")):
        _, _, b_ih, b_hh = layer_params[d]
        b_ih = jnp.asarray(b_ih, jnp.float32)
        b_hh = jnp.asarray(b_hh, jnp.float32)
        fused = jnp.concatenate([b_ih[:2 * H] + b_hh[:2 * H], b_ih[2 * H:3 * H]])
        out = out.at[0, base:base + 3 * H].set(fused)
    return out


def _pack_b_hn(layer_params, H, Gp):
    out = jnp.zeros((1, 2 * Gp), jnp.float32)
    for base, d in ((0, "fwd"), (Gp, "bwd")):
        b_hh = jnp.asarray(layer_params[d][3], jnp.float32)
        out = out.at[0, base + 2 * H:base + 3 * H].set(b_hh[2 * H:])
    return out


# ----------------------------------------------------------------------------
# Encoder forward (single fused Pallas kernel; padding glue in plain JAX).
# ----------------------------------------------------------------------------
@functools.partial(jax.jit, static_argnames=("n_layers", "gi_dtype", "roll_fwd"))
def _encoder_forward_impl(params, tokens, *, n_layers, gi_dtype, roll_fwd):
    emb_table = params["embedding"]
    B, S = tokens.shape
    E = emb_table.shape[1]
    H = params["gru"][0]["fwd"][1].shape[1]           # w_hh: (3H, H)

    Gp = _round_up(3 * H, 128)                        # packed per-direction width
    Ep = _round_up(E, 128)
    Bp = _round_up(B, 8)
    W2 = 2 * Gp
    hoff = 2 * H

    # Embedding lookup; dropout -> identity (inference semantics).
    emb = emb_table[tokens].astype(jnp.float32)                   # (B, S, E)
    x = jnp.transpose(emb, (1, 0, 2))                             # (S, B, E)
    x = jnp.pad(x, ((0, 0), (0, Bp - B), (0, Ep - E)))            # (S, Bp, Ep)
    x = x.reshape(S * Bp, Ep).astype(gi_dtype)                    # flat slab

    kernel_inputs = [x]
    for l in range(n_layers):
        lp = params["gru"][l]
        w_ih_f, w_hh_f, _, _ = lp["fwd"]
        w_ih_b, w_hh_b, _, _ = lp["bwd"]
        kernel_inputs += [
            _pack_w_ih(w_ih_f, w_ih_b, l, H, Gp, Ep, gi_dtype),
            _pack_w_hh(w_hh_f, w_hh_b, H, Gp),
            _pack_b_ih(lp, H, Gp),
            _pack_b_hn(lp, H, Gp),
        ]

    num_bufs = min(n_layers - 1, 2)
    scratch = [
        pltpu.VMEM((S * Bp, W2), jnp.float32),        # fused gi slab
        pltpu.VMEM((Bp, W2), jnp.float32),            # packed [hf | hb] state
    ] + [pltpu.VMEM((S * Bp, W2), jnp.float32) for _ in range(num_bufs)]

    # Explicit VMEM budget (v5e default scoped limit is 16 MiB; v7x has 64 MiB
    # physical).  Whole-sequence-resident design; see module TODO for the
    # time-chunked gridded variant when this does not fit.
    est = sum(int(a.size) * a.dtype.itemsize for a in kernel_inputs)
    est += S * Bp * W2 * 4 + 2 * n_layers * Bp * Gp * 4             # outputs
    est += (2 + num_bufs) * S * Bp * W2 * 4 + Bp * W2 * 4           # scratch
    vmem_limit = int(min(max(2 * est, 32 * 1024 * 1024), 64 * 1024 * 1024))

    vmem = pl.BlockSpec(memory_space=pltpu.MemorySpace.VMEM)
    kernel = make_encoder_kernel(n_layers, S, Bp, H, Gp, num_bufs, roll_fwd)

    y_pad, h_pad = pl.pallas_call(
        kernel,
        out_shape=(jax.ShapeDtypeStruct((S * Bp, W2), jnp.float32),
                   jax.ShapeDtypeStruct((2 * n_layers, Bp, Gp), jnp.float32)),
        in_specs=[vmem] * len(kernel_inputs),
        out_specs=(vmem, vmem),
        scratch_shapes=scratch,
        compiler_params=pltpu.CompilerParams(vmem_limit_bytes=vmem_limit),
    )(*kernel_inputs)

    # Un-pad: real hidden lanes sit on the n-gate block [2H:3H] of each half.
    y = y_pad.reshape(S, Bp, W2)
    outputs = jnp.concatenate(
        [y[:, :B, hoff:hoff + H], y[:, :B, Gp + hoff:Gp + hoff + H]], axis=-1)
    outputs = jnp.transpose(outputs, (1, 0, 2))                   # (B, S, 2H)
    hidden = h_pad[:, :B, hoff:hoff + H]                          # (2*n_layers, B, H)
    return outputs, hidden


def encoder_forward(params, tokens, *, n_layers, gi_dtype=jnp.bfloat16):
    # The roll-direction probe runs eagerly (cached) so its result can be a
    # static kernel constant.
    return _encoder_forward_impl(params, tokens, n_layers=n_layers,
                                 gi_dtype=gi_dtype, roll_fwd=_roll_is_forward())


# ----------------------------------------------------------------------------
# Pure-JAX reference (lax.scan) used only as a correctness check.
# ----------------------------------------------------------------------------
def gru_layer_ref(x_tm, w_ih, w_hh, b_ih, b_hh):
    H = w_hh.shape[1]

    def step(h, x_t):
        gi = x_t @ w_ih.T + b_ih
        gh = h @ w_hh.T + b_hh
        r = jax.nn.sigmoid(gi[:, :H] + gh[:, :H])
        z = jax.nn.sigmoid(gi[:, H:2 * H] + gh[:, H:2 * H])
        n = jnp.tanh(gi[:, 2 * H:] + r * gh[:, 2 * H:])
        h_new = (1.0 - z) * n + z * h
        return h_new, h_new

    h0 = jnp.zeros((x_tm.shape[1], H), jnp.float32)
    h_final, ys = lax.scan(step, h0, x_tm)
    return ys, h_final


def encoder_forward_ref(params, tokens, n_layers):
    emb = params["embedding"][tokens]
    x = jnp.transpose(emb, (1, 0, 2)).astype(jnp.float32)
    hiddens = []
    for layer in range(n_layers):
        y_f, h_f = gru_layer_ref(x, *params["gru"][layer]["fwd"])
        y_b_rev, h_b = gru_layer_ref(x[::-1], *params["gru"][layer]["bwd"])
        y_b = y_b_rev[::-1]
        x = jnp.concatenate([y_f, y_b], axis=-1)
        hiddens.extend([h_f, h_b])
    return jnp.transpose(x, (1, 0, 2)), jnp.stack(hiddens, axis=0)


# ----------------------------------------------------------------------------
# Deterministic parameter init (matches nn.Embedding / nn.GRU shapes).
# ----------------------------------------------------------------------------
def init_params(key, vocab, emb_dim, hid_dim, n_layers):
    k_emb, k_gru = jax.random.split(key)
    params = {
        "embedding": jax.random.normal(k_emb, (vocab, emb_dim), jnp.float32),
        "gru": [],
    }
    bound = 1.0 / jnp.sqrt(hid_dim)
    keys = jax.random.split(k_gru, n_layers * 2 * 4)
    ki = 0
    for layer in range(n_layers):
        in_dim = emb_dim if layer == 0 else 2 * hid_dim
        layer_params = {}
        for direction in ("fwd", "bwd"):
            w_ih = jax.random.uniform(keys[ki], (3 * hid_dim, in_dim),
                                      jnp.float32, -bound, bound); ki += 1
            w_hh = jax.random.uniform(keys[ki], (3 * hid_dim, hid_dim),
                                      jnp.float32, -bound, bound); ki += 1
            b_ih = jax.random.uniform(keys[ki], (3 * hid_dim,),
                                      jnp.float32, -bound, bound); ki += 1
            b_hh = jax.random.uniform(keys[ki], (3 * hid_dim,),
                                      jnp.float32, -bound, bound); ki += 1
            layer_params[direction] = (w_ih, w_hh, b_ih, b_hh)
        params["gru"].append(layer_params)
    return params


if __name__ == "__main__":
    # Small, module-consistent shapes.
    en_vocab_size = 50
    emb_dim = 16
    hid_dim = 32
    n_layers = 2
    batch = 2
    seq = 8

    key = jax.random.PRNGKey(0)
    k_params, k_tok = jax.random.split(key)
    params = init_params(k_params, en_vocab_size, emb_dim, hid_dim, n_layers)
    tokens = jax.random.randint(k_tok, (batch, seq), 0, en_vocab_size, jnp.int32)

    ref_out, ref_hid = encoder_forward_ref(params, tokens, n_layers)

    # Exact f32 path: must match the reference tightly.
    out32, hid32 = encoder_forward(params, tokens, n_layers=n_layers,
                                   gi_dtype=jnp.float32)
    jax.block_until_ready((out32, hid32))
    assert out32.shape == (batch, seq, 2 * hid_dim), out32.shape
    assert hid32.shape == (n_layers * 2, batch, hid_dim), hid32.shape
    assert jnp.allclose(out32, ref_out, atol=1e-4, rtol=1e-4), float(
        jnp.max(jnp.abs(out32 - ref_out)))
    assert jnp.allclose(hid32, ref_hid, atol=1e-4, rtol=1e-4), float(
        jnp.max(jnp.abs(hid32 - ref_hid)))

    # Default fast path: bf16 input projection (MXU native), f32 recurrence.
    out16, hid16 = encoder_forward(params, tokens, n_layers=n_layers)
    jax.block_until_ready((out16, hid16))
    assert out16.shape == (batch, seq, 2 * hid_dim), out16.shape
    assert hid16.shape == (n_layers * 2, batch, hid_dim), hid16.shape
    assert jnp.allclose(out16, ref_out, atol=5e-2, rtol=5e-2), float(
        jnp.max(jnp.abs(out16 - ref_out)))
    assert jnp.allclose(hid16, ref_hid, atol=5e-2, rtol=5e-2), float(
        jnp.max(jnp.abs(hid16 - ref_hid)))

    print("KERNEL_OK")
</pallas_src>

<mosaic_0001>
module attributes {stable_mosaic.version = 11 : i64} {
  func.func @probe(%arg0: memref<8x256xf32, #tpu.memory_space<vmem>>, %arg1: memref<8x256xf32, #tpu.memory_space<vmem>>) attributes {dimension_semantics = [], scalar_prefetch = 0 : i64, scratch_operands = 0 : i64, tpu.core_type = #tpu.core_type<tc>} {
    %c0 = arith.constant 0 : index
    %c0_0 = arith.constant 0 : index
    %0 = vector.load %arg0[%c0, %c0_0] : memref<8x256xf32, #tpu.memory_space<vmem>>, vector<8x256xf32>
    %c1_i32 = arith.constant 1 : i32
    %1 = tpu.dynamic_rotate %0 by %c1_i32 dim 1 : vector<8x256xf32>, i32 -> vector<8x256xf32>
    %c0_1 = arith.constant 0 : index
    %c0_2 = arith.constant 0 : index
    %2 = vector.load %arg1[%c0_1, %c0_2] : memref<8x256xf32, #tpu.memory_space<vmem>>, vector<8x256xf32>
    tpu.vector_store %arg1[%c0_1, %c0_2], %1 {strides = array<i32>} : memref<8x256xf32, #tpu.memory_space<vmem>>, vector<8x256xf32>,
    return
  }
}

</mosaic_0001>

<bundles_post_ra>
// kernel: tpu_custom_call.1
= control target key start
LH: loop header
LB: loop body
LE: loop exit
PB: predicated region body
PF: predicated region fallthrough
CT: control target
= control target key end

     0   :  { %6 = vsyncpa [#allocation3], 0  ;;  %s127_s0 = inlined_call_operand.hbm [shape: f32[8,256], index: 0, kind: input, shape index: {}]   ;;  %s128_s1 = inlined_call_operand.hbm [shape: f32[8,256], index: 1, kind: output, shape index: {}]  }
   0x1   :  { %7 = vsyncpa [#allocation4], 0  ;;  %s13_s8 = sshll.u32 %s127_s0, 4  ;;  %s108_s9 = smov [#allocation2]   ;;  %s14_s8 = int_to_ptr.hbm [resolvable:$true] %s13_s8 }
   0x2   :  { %s15_s10 = sshll.u32 %s108_s9, 4  ;;  %s16_s10 = int_to_ptr.vmem [resolvable:$true] %s15_s10 }
   0x3   :  { %18 = dma.hbm_to_vmem [thread:$0]  %s14_s8, 256, %s16_s10, [#allocation3]  }
   0x4   :  { %104 = dma.done.wait [#allocation3], 256  }
   0x5   :  { %105 = vsyncadd [#allocation3], 4294967040  ;;  %v23_v0 = vld [vmem:[#allocation2] sm:$0xff]  ;;  %s109_s11 = smov 1   ;;  %v24_v1 = vld [vmem:[#allocation2 + $0x8] sm:$0xff]  ;;  %v29_v2 = vlaneseq  ;;  %s110_s12 = smov [#allocation5]  }
   0x6   :  { %25 = vrot.lane.b32.xlu0 %v23_v0, %s109_s11  ;;  %s41_s13 = sshll.u32 %s110_s12, 4  ;;  %s43_s15 = sshll.u32 %s128_s1, 4  ;;  %s42_s13 = int_to_ptr.vmem [resolvable:$true] %s41_s13  ;;  %s44_s15 = int_to_ptr.hbm [resolvable:$true] %s43_s15 }
   0x7   :  { %v30_v4 = vand.u32 127, %v29_v2 }
   0x9   :  { %vm31_vm0 = vcmp.lt.s32.totalorder %v30_v4, 1 }
   0xe   :  { %27 = vrot.lane.b32.xlu0 %v24_v1, %s109_s11 }
  0x78   :  { %v26_v3 = vpop.permute.xlu0 %25 }
  0x80   :  { %v28_v5 = vpop.permute.xlu0 %27 }
  0x81   :  { %v32_v6 = vsel %vm31_vm0, %v26_v3, %v28_v5  ;;  %v33_v7 = vsel %vm31_vm0, %v28_v5, %v26_v3 }
  0x82   :  { %34 = vst [vmem:[#allocation5] sm:$0xff] %v33_v7 }
  0x83   :  { %35 = vst [vmem:[#allocation5 + $0x8] sm:$0xff] %v32_v6 }
  0x84   :  { %46 = dma.vmem_to_hbm [thread:$0]  %s42_s13, 256, %s44_s15, [#allocation4]  }
  0x85   :  { %106 = dma.done.wait [#allocation4], 256  }
  0x86   :  { %107 = vsyncadd [#allocation4], 4294967040 }
  0x87   :  { %51 = vsyncpa [#allocation3], 1 }
  0x88   :  { %52 = vsyncpa [#allocation4], 1 }

</bundles_post_ra>
